<compile_context>
chip_gen: v7x
topology: tpu7x:2x2x1
jax: 0.10.0
libtpu: 0.0.40
codegen_flags: <defaults>
</compile_context>

<pallas_src>
from functools import partial

import numpy as np
import jax
import jax.numpy as jnp
from jax.experimental import pallas as pl
from jax.experimental.pallas import tpu as pltpu

# ----------------------------------------------------------------------------
# Host-side graph glue (no clean Pallas equivalent: dict-based WL relabeling).
# ----------------------------------------------------------------------------

DATA_EMB_DIC = {"demo": (16, 12)}

_SMALL_ROW_LIMIT = 1024     # above this node count, switch to the row-tiled grid path
_DEFAULT_TM = 512           # row tile for the grid path (safe for v7x 64 MiB VMEM)


def weisfeiler_lehman_labels_from_edge_list(edges, max_iterations, node_num):
    """edges: list of (k,2) int arrays [node, neighbor].  Returns {node: int label}."""
    adj = {}
    for e in edges:
        for src, dst in e:
            src, dst = int(src), int(dst)
            adj.setdefault(src, []).append(dst)
            adj.setdefault(dst, []).append(src)
    nodes = sorted(adj.keys())
    labels = {n: 1 for n in nodes}
    for _ in range(max_iterations):
        sig_to_label = {}
        new_labels = {}
        for n in nodes:
            sig = (labels[n], tuple(sorted(labels[m] for m in adj[n])))
            if sig not in sig_to_label:
                sig_to_label[sig] = len(sig_to_label) + 1
            new_labels[n] = sig_to_label[sig]
        labels = new_labels
    return labels


class MeanAggregator:
    """Mirrors the reference MeanAggregator.forward (out_mlp_layer is unused there)."""

    def __init__(self, a_dim, b_dim):
        self.a_dim, self.b_dim = a_dim, b_dim

    def __call__(self, edge_dic_list, node_num):
        edges = []
        for node in edge_dic_list:
            neighs = np.array(edge_dic_list[node]).reshape(-1, 1)
            a = np.array([node]).repeat(len(neighs)).reshape(-1, 1)
            edges.append(np.concatenate([a, neighs], axis=1))
        max_iterations = 3
        return weisfeiler_lehman_labels_from_edge_list(edges, max_iterations, node_num)


def _round_up(x, m):
    return ((x + m - 1) // m) * m


# ----------------------------------------------------------------------------
# Pallas kernels
# ----------------------------------------------------------------------------
#
# Small / latency-bound path: ONE gridless call handling both node sets.
#   fa_ref : (na, d)      feature_a                 (full VMEM block)
#   fb_ref : (nb, d)      feature_b
#   ba_ref : (na, 4d)     per-row layer-1 bias = tp*W1[d] + tn*W1[d+1] + b1  (constant)
#   bb_ref : (nb, 4d)     same for side b
#   w1_ref : (d, 4d)      W1^T feature rows only (no mid-tile slicing needed)
#   w2_ref : (4d, 128)    W2^T zero-padded to 128 lanes
#   b2_ref : (1, 128)     b2 zero-padded to 128 lanes
#   alpha  : (1,) f32 in SMEM (PReLU slope)
#   oa/ob  : (na/nb, 128) lane-dense outputs, sliced to d+2 host-side.

def _pair_update_kernel(fa_ref, fb_ref, ba_ref, bb_ref, w1_ref, w2_ref, b2_ref,
                        alpha_ref, oa_ref, ob_ref):
    hi = jax.lax.Precision.HIGHEST
    alpha = alpha_ref[0]
    w1 = w1_ref[...]
    w2 = w2_ref[...]
    b2 = b2_ref[...]

    ha = jnp.dot(fa_ref[...], w1, precision=hi,
                 preferred_element_type=jnp.float32) + ba_ref[...]
    ha = jnp.where(ha > 0, ha, alpha * ha)                               # PReLU
    oa_ref[...] = jnp.dot(ha, w2, precision=hi,
                          preferred_element_type=jnp.float32) + b2

    hb = jnp.dot(fb_ref[...], w1, precision=hi,
                 preferred_element_type=jnp.float32) + bb_ref[...]
    hb = jnp.where(hb > 0, hb, alpha * hb)
    ob_ref[...] = jnp.dot(hb, w2, precision=hi,
                          preferred_element_type=jnp.float32) + b2


def _pair_update_call(fa, fb, ba, bb, w1, w2, b2, alpha):
    na, nb = fa.shape[0], fb.shape[0]
    npad = w2.shape[1]
    vmem = pl.BlockSpec(memory_space=pltpu.MemorySpace.VMEM)
    smem = pl.BlockSpec(memory_space=pltpu.MemorySpace.SMEM)
    return pl.pallas_call(
        _pair_update_kernel,
        out_shape=(jax.ShapeDtypeStruct((na, npad), jnp.float32),
                   jax.ShapeDtypeStruct((nb, npad), jnp.float32)),
        in_specs=[vmem, vmem, vmem, vmem, vmem, vmem, vmem, smem],
        out_specs=(vmem, vmem),
    )(fa, fb, ba, bb, w1, w2, b2, alpha)


@partial(jax.jit, static_argnames=("d_out",))
def _forward_small(feature_a, feature_b, bias_a, bias_b, w1, w2, b2, alpha, *, d_out):
    oa, ob = _pair_update_call(feature_a.astype(jnp.float32),
                               feature_b.astype(jnp.float32),
                               bias_a, bias_b, w1, w2, b2, alpha)
    return oa[:, :d_out], ob[:, :d_out]


# Row-tiled grid path (large node counts).  x has K = round_up(d+3, 8) columns:
# [features | tp | tn | 1.0 | 0...]; W1_full is (K, 4d) with the tp/tn rows and
# b1 folded in, so layer 1 is a single aligned dot with no bias add.

def _tiled_update_kernel(x_ref, w1_ref, w2_ref, b2_ref, o_ref, *, alpha, precision):
    h = jnp.dot(x_ref[...], w1_ref[...], precision=precision,
                preferred_element_type=jnp.float32)
    h = jnp.where(h > 0, h, alpha * h)                                   # PReLU
    o_ref[...] = jnp.dot(h, w2_ref[...], precision=precision,
                         preferred_element_type=jnp.float32) + b2_ref[...]


def _tiled_update_call(x, w1, w2, b2, *, alpha, tm, precision):
    mp, k = x.shape
    h4 = w1.shape[1]
    npad = w2.shape[1]
    kernel = partial(_tiled_update_kernel, alpha=alpha, precision=precision)
    return pl.pallas_call(
        kernel,
        out_shape=jax.ShapeDtypeStruct((mp, npad), jnp.float32),
        grid=(mp // tm,),
        in_specs=[
            pl.BlockSpec((tm, k), lambda i: (i, 0)),      # x rows, pipelined
            pl.BlockSpec((k, h4), lambda i: (0, 0)),      # W1 (+tpn rows +b1) pinned
            pl.BlockSpec((h4, npad), lambda i: (0, 0)),   # W2 pinned
            pl.BlockSpec((1, npad), lambda i: (0, 0)),    # b2 pinned
        ],
        out_specs=pl.BlockSpec((tm, npad), lambda i: (i, 0)),
        compiler_params=pltpu.CompilerParams(
            dimension_semantics=("parallel",),             # 2-TC sharding on v7x
            vmem_limit_bytes=32 * 1024 * 1024),            # safe on v5e/v6e/v7x
    )(x, w1, w2, b2)


@partial(jax.jit, static_argnames=("alpha", "tm", "d_out", "precision"))
def _forward_tiled(feature, extra, w1_full, w2, b2, *, alpha, tm, d_out,
                   precision=jax.lax.Precision.HIGHEST):
    x = jnp.concatenate([feature.astype(jnp.float32), extra], axis=1)
    m = x.shape[0]
    tm = min(tm, _round_up(m, 8))
    mp = _round_up(m, tm)
    if mp > m:
        x = jnp.pad(x, ((0, mp - m), (0, 0)))
    out = _tiled_update_call(x, w1_full, w2, b2, alpha=alpha, tm=tm,
                             precision=precision)
    return out[:m, :d_out]


# ----------------------------------------------------------------------------
# SBGMNLayer2 (JAX / Pallas version)
# ----------------------------------------------------------------------------

class SBGMNLayer2:
    def __init__(self, edgelist_a_b_pos, edgelist_a_b_neg,
                 edgelist_b_a_pos, edgelist_b_a_neg,
                 dataset_name, dropout, emb_size_a, emb_size_b,
                 aggregator1=MeanAggregator, key=None):
        assert emb_size_a == emb_size_b, "update_func shapes require emb_size_a == emb_size_b"
        self.set_a_num, self.set_b_num = DATA_EMB_DIC[dataset_name]
        self.dropout = dropout   # TODO(synk): training-mode dropout not modeled (identity).
        self.agg_a_from_b_pos = aggregator1(emb_size_b, emb_size_a)
        self.agg_a_from_b_neg = aggregator1(emb_size_b, emb_size_a)
        self.agg_b_from_a_pos = aggregator1(emb_size_a, emb_size_b)
        self.agg_b_from_a_neg = aggregator1(emb_size_a, emb_size_b)

        d = emb_size_a
        self.d = d
        self.d_out = d + 2
        self._out_pad = _round_up(self.d_out, 128)   # lane-dense output width
        self._k_full = _round_up(d + 3, 8)           # sublane-aligned K for the tiled path

        # ---- update_func parameters (PyTorch default Linear / PReLU inits) ----
        if key is None:
            key = jax.random.PRNGKey(0)
        k1, k2, k3, k4 = jax.random.split(key, 4)
        bound1 = 1.0 / np.sqrt(d + 2)
        bound2 = 1.0 / np.sqrt(4 * d)
        w1_t = np.asarray(jax.random.uniform(k1, (d + 2, 4 * d), jnp.float32, -bound1, bound1))
        b1 = np.asarray(jax.random.uniform(k2, (4 * d,), jnp.float32, -bound1, bound1))
        w2_t = np.asarray(jax.random.uniform(k3, (4 * d, d + 2), jnp.float32, -bound2, bound2))
        b2 = np.asarray(jax.random.uniform(k4, (d + 2,), jnp.float32, -bound2, bound2))
        alpha0 = 0.25                                # nn.PReLU() default init

        # numpy copies kept only for the host reference check
        self._w1_t_np, self._b1_np = w1_t, b1
        self._w2_t_np, self._b2_np = w2_t, b2
        self._alpha0 = alpha0

        # ---- one-time host work: WL labels -> L2-normalized columns ----
        na, nb = self.set_a_num, self.set_b_num
        col_a_pos = self._wl_column_np(self.agg_a_from_b_pos, edgelist_a_b_pos, na, na)
        col_a_neg = self._wl_column_np(self.agg_a_from_b_neg, edgelist_a_b_neg, na, na)
        col_b_pos = self._wl_column_np(self.agg_b_from_a_pos, edgelist_b_a_pos, nb, nb)
        col_b_neg = self._wl_column_np(self.agg_b_from_a_neg, edgelist_b_a_neg, nb, nb)
        self._cols = (col_a_pos, col_a_neg, col_b_pos, col_b_neg)

        # ---- packed, device-resident operands (built once) ----
        # Small path: constant per-row layer-1 bias = tp*W1[d] + tn*W1[d+1] + b1.
        bias_a = (col_a_pos[:, None] * w1_t[d][None, :]
                  + col_a_neg[:, None] * w1_t[d + 1][None, :] + b1[None, :])
        bias_b = (col_b_pos[:, None] * w1_t[d][None, :]
                  + col_b_neg[:, None] * w1_t[d + 1][None, :] + b1[None, :])
        self.w1_feat = jnp.asarray(w1_t[:d])                          # (d, 4d)
        self.bias_a = jnp.asarray(bias_a.astype(np.float32))          # (na, 4d)
        self.bias_b = jnp.asarray(bias_b.astype(np.float32))          # (nb, 4d)

        # W2 / b2 zero-padded to 128 lanes (unmasked vst in the kernel).
        w2p = np.zeros((4 * d, self._out_pad), np.float32)
        w2p[:, :d + 2] = w2_t
        b2p = np.zeros((1, self._out_pad), np.float32)
        b2p[0, :d + 2] = b2
        self.w2 = jnp.asarray(w2p)
        self.b2 = jnp.asarray(b2p)
        self.alpha = jnp.full((1,), alpha0, jnp.float32)

        # Tiled path: W1 with tp/tn rows + b1 folded in, K padded to a sublane multiple,
        # and the constant extra x-columns [tp | tn | 1 | 0...] per side.
        kf = self._k_full
        w1f = np.zeros((kf, 4 * d), np.float32)
        w1f[:d + 2] = w1_t
        w1f[d + 2] = b1
        self.w1_full = jnp.asarray(w1f)                               # (K, 4d)
        extra_a = np.zeros((na, kf - d), np.float32)
        extra_a[:, 0], extra_a[:, 1], extra_a[:, 2] = col_a_pos, col_a_neg, 1.0
        extra_b = np.zeros((nb, kf - d), np.float32)
        extra_b[:, 0], extra_b[:, 1], extra_b[:, 2] = col_b_pos, col_b_neg, 1.0
        self.extra_a = jnp.asarray(extra_a)
        self.extra_b = jnp.asarray(extra_b)

    @staticmethod
    def _wl_column_np(agg, edge_dic, node_num, offset):
        """WL label column, L2-normalized on the host (F.normalize p=2 dim=0 semantics)."""
        shifted = {k: [v + offset for v in vals] for k, vals in edge_dic.items()}
        labels = agg(shifted, node_num)
        col = np.array([float(labels[key]) if key in labels else 0.0
                        for key in range(1, node_num + 1)], dtype=np.float32)
        norm = float(np.sqrt(np.sum(col * col)))
        return col / max(norm, 1e-12)

    def forward(self, feature_a, feature_b):
        # Dropout is identity in inference mode.
        if max(self.set_a_num, self.set_b_num) <= _SMALL_ROW_LIMIT:
            return _forward_small(feature_a, feature_b, self.bias_a, self.bias_b,
                                  self.w1_feat, self.w2, self.b2, self.alpha,
                                  d_out=self.d_out)
        new_a = _forward_tiled(feature_a, self.extra_a, self.w1_full, self.w2, self.b2,
                               alpha=self._alpha0, tm=_DEFAULT_TM, d_out=self.d_out)
        new_b = _forward_tiled(feature_b, self.extra_b, self.w1_full, self.w2, self.b2,
                               alpha=self._alpha0, tm=_DEFAULT_TM, d_out=self.d_out)
        return new_a, new_b

    __call__ = forward


# ----------------------------------------------------------------------------
# Demo + numpy reference check
# ----------------------------------------------------------------------------

def _make_edge_dict(rng, n_src, n_dst, max_deg=4):
    d = {}
    for node in range(1, n_src + 1):
        deg = int(rng.randint(1, max_deg + 1))
        d[node] = sorted(int(x) for x in rng.randint(1, n_dst + 1, size=deg))
    return d


if __name__ == "__main__":
    emb = 32
    n_a, n_b = DATA_EMB_DIC["demo"]

    rng = np.random.RandomState(0)
    edge_a_b_pos = _make_edge_dict(rng, n_a, n_b)
    edge_a_b_neg = _make_edge_dict(rng, n_a, n_b)
    edge_b_a_pos = _make_edge_dict(rng, n_b, n_a)
    edge_b_a_neg = _make_edge_dict(rng, n_b, n_a)

    key = jax.random.PRNGKey(0)
    k_fa, k_fb, k_params = jax.random.split(key, 3)
    feature_a = jax.random.normal(k_fa, (n_a, emb), jnp.float32)
    feature_b = jax.random.normal(k_fb, (n_b, emb), jnp.float32)

    layer = SBGMNLayer2(edge_a_b_pos, edge_a_b_neg, edge_b_a_pos, edge_b_a_neg,
                        dataset_name="demo", dropout=0.5,
                        emb_size_a=emb, emb_size_b=emb, key=k_params)

    out_a, out_b = layer(feature_a, feature_b)
    jax.block_until_ready((out_a, out_b))

    assert out_a.shape == (n_a, emb + 2) and out_b.shape == (n_b, emb + 2)
    assert jnp.all(jnp.isfinite(out_a)) and jnp.all(jnp.isfinite(out_b))

    # Numpy reference (same math, unfused: concat -> Linear -> PReLU -> Linear).
    def ref_update(feat, tp, tn):
        x = np.concatenate([feat, tp[:, None], tn[:, None]], axis=1)
        h = x @ layer._w1_t_np + layer._b1_np
        h = np.where(h > 0, h, layer._alpha0 * h)
        return h @ layer._w2_t_np + layer._b2_np

    ca_p, ca_n, cb_p, cb_n = layer._cols
    ref_a = ref_update(np.asarray(feature_a), ca_p, ca_n)
    ref_b = ref_update(np.asarray(feature_b), cb_p, cb_n)
    np.testing.assert_allclose(np.asarray(out_a), ref_a, rtol=1e-3, atol=1e-3)
    np.testing.assert_allclose(np.asarray(out_b), ref_b, rtol=1e-3, atol=1e-3)

    # Also exercise the row-tiled grid path (used for large node counts) with a
    # small synthetic block so both kernels are validated on-device.
    m_big = 300
    feat_big = jax.random.normal(jax.random.PRNGKey(1), (m_big, emb), jnp.float32)
    tp_big = rng.rand(m_big).astype(np.float32)
    tn_big = rng.rand(m_big).astype(np.float32)
    extra_big = np.zeros((m_big, layer._k_full - emb), np.float32)
    extra_big[:, 0], extra_big[:, 1], extra_big[:, 2] = tp_big, tn_big, 1.0
    out_big = _forward_tiled(feat_big, jnp.asarray(extra_big),
                             layer.w1_full, layer.w2, layer.b2,
                             alpha=layer._alpha0, tm=128, d_out=layer.d_out)
    jax.block_until_ready(out_big)
    ref_big = ref_update(np.asarray(feat_big), tp_big, tn_big)
    np.testing.assert_allclose(np.asarray(out_big), ref_big, rtol=1e-3, atol=1e-3)

    print("KERNEL_OK")
</pallas_src>

<mosaic_0001>
module attributes {stable_mosaic.version = 11 : i64} {
  func.func @_pair_update_kernel(%arg0: memref<16x32xf32, #tpu.memory_space<vmem>>, %arg1: memref<12x32xf32, #tpu.memory_space<vmem>>, %arg2: memref<16x128xf32, #tpu.memory_space<vmem>>, %arg3: memref<12x128xf32, #tpu.memory_space<vmem>>, %arg4: memref<32x128xf32, #tpu.memory_space<vmem>>, %arg5: memref<128x128xf32, #tpu.memory_space<vmem>>, %arg6: memref<1x128xf32, #tpu.memory_space<vmem>>, %arg7: memref<1xf32, #tpu.memory_space<smem>>, %arg8: memref<16x128xf32, #tpu.memory_space<vmem>>, %arg9: memref<12x128xf32, #tpu.memory_space<vmem>>) attributes {dimension_semantics = [], scalar_prefetch = 0 : i64, scratch_operands = 0 : i64, tpu.core_type = #tpu.core_type<tc>} {
    %c0 = arith.constant 0 : index
    %0 = memref.load %arg7[%c0] : memref<1xf32, #tpu.memory_space<smem>>
    %c0_0 = arith.constant 0 : index
    %c0_1 = arith.constant 0 : index
    %1 = vector.load %arg4[%c0_0, %c0_1] : memref<32x128xf32, #tpu.memory_space<vmem>>, vector<32x128xf32>
    %c0_2 = arith.constant 0 : index
    %c0_3 = arith.constant 0 : index
    %2 = vector.load %arg5[%c0_2, %c0_3] : memref<128x128xf32, #tpu.memory_space<vmem>>, vector<128x128xf32>
    %c0_4 = arith.constant 0 : index
    %c0_5 = arith.constant 0 : index
    %3 = vector.load %arg6[%c0_4, %c0_5] : memref<1x128xf32, #tpu.memory_space<vmem>>, vector<1x128xf32>
    %c0_6 = arith.constant 0 : index
    %c0_7 = arith.constant 0 : index
    %4 = vector.load %arg0[%c0_6, %c0_7] : memref<16x32xf32, #tpu.memory_space<vmem>>, vector<16x32xf32>
    %cst = arith.constant dense<0.000000e+00> : vector<16x128xf32>
    %5 = tpu.matmul %4, %1, %cst {dimension_numbers = #tpu.dot_dimension_numbers<[1], [0], [0], [1], [0, 0, 1, 1], [], []>, precision = #tpu.contract_precision<fp32>} : vector<16x32xf32>, vector<32x128xf32>, vector<16x128xf32> -> vector<16x128xf32>
    %c0_8 = arith.constant 0 : index
    %c0_9 = arith.constant 0 : index
    %6 = vector.load %arg2[%c0_8, %c0_9] : memref<16x128xf32, #tpu.memory_space<vmem>>, vector<16x128xf32>
    %7 = arith.addf %5, %6 : vector<16x128xf32>
    %cst_10 = arith.constant 0.000000e+00 : f32
    %8 = vector.broadcast %cst_10 : f32 to vector<16x128xf32>
    %9 = arith.cmpf ogt, %7, %8 : vector<16x128xf32>
    %10 = vector.broadcast %0 : f32 to vector<16x128xf32>
    %11 = arith.mulf %10, %7 : vector<16x128xf32>
    %12 = arith.select %9, %7, %11 : vector<16x128xi1>, vector<16x128xf32>
    %cst_11 = arith.constant dense<0.000000e+00> : vector<16x128xf32>
    %13 = tpu.matmul %12, %2, %cst_11 {dimension_numbers = #tpu.dot_dimension_numbers<[1], [0], [0], [1], [0, 0, 1, 1], [], []>, precision = #tpu.contract_precision<fp32>} : vector<16x128xf32>, vector<128x128xf32>, vector<16x128xf32> -> vector<16x128xf32>
    %14 = vector.broadcast %3 : vector<1x128xf32> to vector<16x128xf32>
    %15 = arith.addf %13, %14 : vector<16x128xf32>
    %c0_12 = arith.constant 0 : index
    %c0_13 = arith.constant 0 : index
    %16 = vector.load %arg8[%c0_12, %c0_13] : memref<16x128xf32, #tpu.memory_space<vmem>>, vector<16x128xf32>
    tpu.vector_store %arg8[%c0_12, %c0_13], %15 {strides = array<i32>} : memref<16x128xf32, #tpu.memory_space<vmem>>, vector<16x128xf32>,
    %c0_14 = arith.constant 0 : index
    %c0_15 = arith.constant 0 : index
    %17 = vector.load %arg1[%c0_14, %c0_15] : memref<12x32xf32, #tpu.memory_space<vmem>>, vector<12x32xf32>
    %cst_16 = arith.constant dense<0.000000e+00> : vector<12x128xf32>
    %18 = tpu.matmul %17, %1, %cst_16 {dimension_numbers = #tpu.dot_dimension_numbers<[1], [0], [0], [1], [0, 0, 1, 1], [], []>, precision = #tpu.contract_precision<fp32>} : vector<12x32xf32>, vector<32x128xf32>, vector<12x128xf32> -> vector<12x128xf32>
    %c0_17 = arith.constant 0 : index
    %c0_18 = arith.constant 0 : index
    %19 = vector.load %arg3[%c0_17, %c0_18] : memref<12x128xf32, #tpu.memory_space<vmem>>, vector<12x128xf32>
    %20 = arith.addf %18, %19 : vector<12x128xf32>
    %cst_19 = arith.constant 0.000000e+00 : f32
    %21 = vector.broadcast %cst_19 : f32 to vector<12x128xf32>
    %22 = arith.cmpf ogt, %20, %21 : vector<12x128xf32>
    %23 = vector.broadcast %0 : f32 to vector<12x128xf32>
    %24 = arith.mulf %23, %20 : vector<12x128xf32>
    %25 = arith.select %22, %20, %24 : vector<12x128xi1>, vector<12x128xf32>
    %cst_20 = arith.constant dense<0.000000e+00> : vector<12x128xf32>
    %26 = tpu.matmul %25, %2, %cst_20 {dimension_numbers = #tpu.dot_dimension_numbers<[1], [0], [0], [1], [0, 0, 1, 1], [], []>, precision = #tpu.contract_precision<fp32>} : vector<12x128xf32>, vector<128x128xf32>, vector<12x128xf32> -> vector<12x128xf32>
    %27 = vector.broadcast %3 : vector<1x128xf32> to vector<12x128xf32>
    %28 = arith.addf %26, %27 : vector<12x128xf32>
    %c0_21 = arith.constant 0 : index
    %c0_22 = arith.constant 0 : index
    %29 = vector.load %arg9[%c0_21, %c0_22] : memref<12x128xf32, #tpu.memory_space<vmem>>, vector<12x128xf32>
    tpu.vector_store %arg9[%c0_21, %c0_22], %28 {strides = array<i32>} : memref<12x128xf32, #tpu.memory_space<vmem>>, vector<12x128xf32>,
    return
  }
}

</mosaic_0001>

<bundles_post_ra>
// kernel: _forward_small.1
= control target key start
LH: loop header
LB: loop body
LE: loop exit
PB: predicated region body
PF: predicated region fallthrough
CT: control target
= control target key end

     0   :  { %16 = vsyncpa [#allocation4], 0  ;;  %s5009_s0 = inlined_call_operand.hbm [shape: f32[16,32], index: 0, kind: input, shape index: {}]   ;;  %s5010_s1 = inlined_call_operand.hbm [shape: f32[12,32], index: 1, kind: input, shape index: {}]   ;;  %s5011_s2 = inlined_call_operand.hbm [shape: f32[16,128], index: 2, kind: input, shape index: {}]   ;;  %s5012_s3 = inlined_call_operand.hbm [shape: f32[12,128], index: 3, kind: input, shape index: {}]   ;;  %s5013_s4 = inlined_call_operand.hbm [shape: f32[32,128], index: 4, kind: input, shape index: {}]   ;;  %s5014_s5 = inlined_call_operand.hbm [shape: f32[128,128], index: 5, kind: input, shape index: {}]   ;;  %s5015_s6 = inlined_call_operand.vmem [shape: f32[1,128], index: 6, kind: input, shape index: {}]   ;;  %s5016_s7 = inlined_call_operand.<no memory space> [shape: f32[1], index: 7, kind: input, shape index: {}]   ;;  %s5017_s8 = inlined_call_operand.hbm [shape: f32[16,128], index: 8, kind: output, shape index: {0}]   ;;  %s5018_s9 = inlined_call_operand.hbm [shape: f32[12,128], index: 9, kind: output, shape index: {1}]  }
   0x1   :  { %17 = vsyncpa [#allocation7], 0 }
   0x2   :  { %18 = vsyncpa [#allocation10], 0 }
   0x3   :  { %19 = vsyncpa [#allocation13], 0 }
   0x4   :  { %20 = vsyncpa [#allocation5], 0 }
   0x5   :  { %21 = vsyncpa [#allocation16], 0  ;;  %s4209_s30 = smov [#allocation6]   ;;  %s4210_s11 = smov [#allocation9]  }
   0x6   :  { %s39_s10 = sshll.u32 %s4209_s30, 4  ;;  %s63_s12 = sshll.u32 %s4210_s11, 4  ;;  %s40_s10 = int_to_ptr.vmem [resolvable:$true] %s39_s10  ;;  %s4269_s12 = int_to_ptr.vmem [resolvable:$true] %s63_s12 }
   0x7   :  { %s4021_s15 = scalar_lea.hbm %s5010_s1, 256 }
   0x8   :  { %p4022_p0 = scmp.ne.s32.totalorder %s5010_s1, %s4021_s15  ;;  %p4025_p1 = scmp.lt.u32.totalorder %s4021_s15, %s5010_s1 }
   0xa   :  { %p4027_p2 = pnand %p4025_p1, %p4022_p0 }
   0xc   :  { %4030 = shalt.err (!%p4027_p2)
}
   0xd   :  { %s4031_s20 = scalar_lea.vmem %s40_s10, 256  ;;  %p4036_p4 = scmp.lt.s32.totalorder %s40_s10, %s40_s10 }
   0xe   :  { %p4032_p3 = scmp.ne.s32.totalorder %s40_s10, %s4031_s20  ;;  %p4037_p5 = scmp.lt.s32.totalorder %s4031_s20, %s4031_s20 }
  0x10   :  { %p4038_p6 = por %p4037_p5, %p4036_p4 }
  0x12   :  { %p4039_p7 = pnand %p4038_p6, %p4032_p3 }
  0x14   :  { %4042 = shalt.err (!%p4039_p7)
}
  0x15   :  { %s4211_s21 = smov 128   ;;  %s4212_s22 = smov 8  }
  0x16   :  { %45 = dma.hbm_to_vmem [thread:$0]  %s5010_s1, 256, %s40_s10, [#allocation7], %s4211_s21, %s4211_s21, %s4212_s22  }
  0x17   :  { %s4043_s27 = scalar_lea.hbm %s5012_s3, 256 }
  0x18   :  { %p4044_p8 = scmp.ne.s32.totalorder %s5012_s3, %s4043_s27  ;;  %p4047_p9 = scmp.lt.u32.totalorder %s4043_s27, %s5012_s3 }
  0x1a   :  { %p4049_p10 = pnand %p4047_p9, %p4044_p8 }
  0x1c   :  { %4052 = shalt.err (!%p4049_p10)
}
  0x1d   :  { %s4053_s13 = scalar_lea.vmem %s4269_s12, 256  ;;  %p4058_p12 = scmp.lt.s32.totalorder %s4269_s12, %s4269_s12 }
  0x1e   :  { %p4054_p11 = scmp.ne.s32.totalorder %s4269_s12, %s4053_s13  ;;  %p4059_p13 = scmp.lt.s32.totalorder %s4053_s13, %s4053_s13 }
  0x20   :  { %p4060_p0 = por %p4059_p13, %p4058_p12 }
  0x22   :  { %p4061_p1 = pnand %p4060_p0, %p4054_p11 }
  0x24   :  { %4064 = shalt.err (!%p4061_p1)
}
  0x25   :  { %69 = dma.hbm_to_vmem [thread:$0]  %s5012_s3, 256, %s4269_s12, [#allocation10], %s4211_s21, %s4211_s21, %s4212_s22  }
  0x26   :  { %s4213_s14 = smov [#allocation3]   ;;  %s4214_s16 = smov [#allocation8]  }
  0x27   :  { %s27_s15 = sshll.u32 %s4213_s14, 4  ;;  %s51_s17 = sshll.u32 %s4214_s16, 4  ;;  %s28_s15 = int_to_ptr.vmem [resolvable:$true] %s27_s15  ;;  %s4306_s17 = int_to_ptr.vmem [resolvable:$true] %s51_s17 }
  0x28   :  { %s4065_s20 = scalar_lea.hbm %s5009_s0, 256 }
  0x29   :  { %p4066_p2 = scmp.ne.s32.totalorder %s5009_s0, %s4065_s20  ;;  %p4069_p3 = scmp.lt.u32.totalorder %s4065_s20, %s5009_s0 }
  0x2b   :  { %p4071_p4 = pnand %p4069_p3, %p4066_p2 }
  0x2d   :  { %4074 = shalt.err (!%p4071_p4)
}
  0x2e   :  { %s4075_s3 = scalar_lea.vmem %s28_s15, 256  ;;  %p4080_p6 = scmp.lt.s32.totalorder %s28_s15, %s28_s15 }
  0x2f   :  { %p4076_p5 = scmp.ne.s32.totalorder %s28_s15, %s4075_s3  ;;  %p4081_p7 = scmp.lt.s32.totalorder %s4075_s3, %s4075_s3 }
  0x31   :  { %p4082_p8 = por %p4081_p7, %p4080_p6 }
  0x33   :  { %p4083_p9 = pnand %p4082_p8, %p4076_p5 }
  0x35   :  { %4086 = shalt.err (!%p4083_p9)
}
  0x36   :  { %33 = dma.hbm_to_vmem [thread:$0]  %s5009_s0, 256, %s28_s15, [#allocation4], %s4211_s21, %s4211_s21, %s4212_s22  }
  0x37   :  { %s4087_s30 = scalar_lea.hbm %s5011_s2, 256 }
  0x38   :  { %p4088_p10 = scmp.ne.s32.totalorder %s5011_s2, %s4087_s30  ;;  %p4091_p11 = scmp.lt.u32.totalorder %s4087_s30, %s5011_s2 }
  0x3a   :  { %p4093_p12 = pnand %p4091_p11, %p4088_p10 }
  0x3c   :  { %4096 = shalt.err (!%p4093_p12)
}
  0x3d   :  { %s4097_s14 = scalar_lea.vmem %s4306_s17, 256  ;;  %p4102_p0 = scmp.lt.s32.totalorder %s4306_s17, %s4306_s17 }
  0x3e   :  { %p4098_p13 = scmp.ne.s32.totalorder %s4306_s17, %s4097_s14  ;;  %p4103_p1 = scmp.lt.s32.totalorder %s4097_s14, %s4097_s14 }
  0x40   :  { %p4104_p2 = por %p4103_p1, %p4102_p0 }
  0x42   :  { %p4105_p3 = pnand %p4104_p2, %p4098_p13 }
  0x44   :  { %4108 = shalt.err (!%p4105_p3)
}
  0x45   :  { %57 = dma.hbm_to_vmem [thread:$0]  %s5011_s2, 256, %s4306_s17, [#allocation7], %s4211_s21, %s4211_s21, %s4212_s22  }
  0x46   :  { %s4215_s16 = smov [#allocation11]   ;;  %s4216_s19 = smov [#allocation12]  }
  0x47   :  { %s75_s18 = sshll.u32 %s4215_s16, 4  ;;  %s87_s20 = sshll.u32 %s4216_s19, 4  ;;  %s76_s18 = int_to_ptr.vmem [resolvable:$true] %s75_s18  ;;  %s4343_s20 = int_to_ptr.vmem [resolvable:$true] %s87_s20 }
  0x48   :  { %s4109_s25 = scalar_lea.hbm %s5013_s4, 512 }
  0x49   :  { %p4110_p4 = scmp.ne.s32.totalorder %s5013_s4, %s4109_s25  ;;  %p4113_p5 = scmp.lt.u32.totalorder %s4109_s25, %s5013_s4 }
  0x4b   :  { %p4115_p6 = pnand %p4113_p5, %p4110_p4 }
  0x4d   :  { %4118 = shalt.err (!%p4115_p6)
}
  0x4e   :  { %s4119_s2 = scalar_lea.vmem %s76_s18, 512  ;;  %p4124_p8 = scmp.lt.s32.totalorder %s76_s18, %s76_s18 }
  0x4f   :  { %p4120_p7 = scmp.ne.s32.totalorder %s76_s18, %s4119_s2  ;;  %p4125_p9 = scmp.lt.s32.totalorder %s4119_s2, %s4119_s2 }
  0x51   :  { %p4126_p10 = por %p4125_p9, %p4124_p8 }
  0x53   :  { %p4127_p11 = pnand %p4126_p10, %p4120_p7 }
  0x55   :  { %4130 = shalt.err (!%p4127_p11)
}
  0x56   :  { %81 = dma.hbm_to_vmem [thread:$0]  %s5013_s4, 512, %s76_s18, [#allocation10], %s4211_s21, %s4211_s21, %s4212_s22  }
  0x57   :  { %s4131_s11 = scalar_lea.hbm %s5014_s5, 2048 }
  0x58   :  { %p4132_p12 = scmp.ne.s32.totalorder %s5014_s5, %s4131_s11  ;;  %p4135_p13 = scmp.lt.u32.totalorder %s4131_s11, %s5014_s5 }
  0x5a   :  { %p4137_p0 = pnand %p4135_p13, %p4132_p12 }
  0x5c   :  { %4140 = shalt.err (!%p4137_p0)
}
  0x5d   :  { %s4141_s0 = scalar_lea.vmem %s4343_s20, 2048  ;;  %p4146_p2 = scmp.lt.s32.totalorder %s4343_s20, %s4343_s20 }
  0x5e   :  { %p4142_p1 = scmp.ne.s32.totalorder %s4343_s20, %s4141_s0  ;;  %p4147_p3 = scmp.lt.s32.totalorder %s4141_s0, %s4141_s0 }
  0x60   :  { %p4148_p4 = por %p4147_p3, %p4146_p2 }
  0x62   :  { %p4149_p5 = pnand %p4148_p4, %p4142_p1 }
  0x64   :  { %4152 = shalt.err (!%p4149_p5)
}
  0x65   :  { %93 = dma.hbm_to_vmem [thread:$0]  %s5014_s5, 2048, %s4343_s20, [#allocation13], %s4211_s21, %s4211_s21, %s4212_s22  }
  0x66   :  { %4197 = dma.done.wait [#allocation4], 256  }
  0x67   :  { %4198 = vsyncadd [#allocation4], 4294967040 }
  0x68   :  { %4199 = dma.done.wait [#allocation7], 512  }
  0x69   :  { %4200 = vsyncadd [#allocation7], 4294966784 }
  0x6a   :  { %4201 = dma.done.wait [#allocation10], 768  }
  0x6b   :  { %4202 = vsyncadd [#allocation10], 4294966528 }
  0x6c   :  { %4203 = dma.done.wait [#allocation13], 2048  }
  0x6d   :  { %4204 = vsyncadd [#allocation13], 4294965248  ;;  %vm142_vm0 = vcmask 261120   ;;  %v117_v0 = vld [vmem:[#allocation11] sm:$0xff]  ;;  %v118_v1 = vld [vmem:[#allocation11 + $0x8] sm:$0xff]  ;;  %s4217_s19 = smov [#allocation14]  }
  0x6e   :  { %v119_v2 = vld [vmem:[#allocation11 + $0x10] sm:$0xff]  ;;  %v150_v3 = vand.u32 4294901760, %v117_v0  ;;  %v153_v4 = vand.u32 4294901760, %v118_v1  ;;  %v120_v5 = vld [vmem:[#allocation11 + $0x18] sm:$0xff]  ;;  %v138_v7 = vld [vmem:[#allocation3] sm:$0xff]  ;;  %s2611_s20 = sshll.u32 %s4217_s19, 4  ;;  %s2612_s20 = int_to_ptr.vmem [resolvable:$true] %s2611_s20 }
  0x6f   :  { %v156_v6 = vand.u32 4294901760, %v119_v2  ;;  %v139_v8 = vld [vmem:[#allocation3 + $0x8] sm:$0xff]  ;;  %v159_v9 = vand.u32 4294901760, %v120_v5  ;;  %v144_v10 = vsel %vm142_vm0, %v138_v7, 0  ;;  %v4413_v38 = vld [vmem:[#allocation12] sm:$0xff]  ;;  %v1376_v48 = vld [vmem:[#allocation6] sm:$0xff]  ;;  %p4158_p7 = scmp.lt.s32.totalorder %s2612_s20, %s2612_s20 }
  0x70   :  { %v147_v11 = vsel %vm142_vm0, %v139_v8, 0  ;;  %v4382_v12 = vpack.c.bf16 %v153_v4, %v150_v3  ;;  %v240_v13 = vsub.f32 %v117_v0, %v150_v3  ;;  %v247_v14 = vsub.f32 %v118_v1, %v153_v4  ;;  %v4415_v39 = vld [vmem:[#allocation12 + $0x8] sm:$0xff]  ;;  %v4424_v49 = vld [vmem:[#allocation12 + $0x10] sm:$0xff]  ;;  %v4426_v50 = vld [vmem:[#allocation12 + $0x18] sm:$0xff]  ;;  %s4153_s23 = scalar_lea.vmem %s2612_s20, 256 }
  0x71   :  { %v4384_v15 = vsub.f32 %v119_v2, %v156_v6  ;;  %v4386_v16 = vpack.c.bf16 %v159_v9, %v156_v6  ;;  %v4388_v17 = vsub.f32 %v120_v5, %v159_v9  ;;  %v4390_v18 = vand.u32 4294901760, %v144_v10  ;;  %v1377_v57 = vld [vmem:[#allocation6 + $0x8] sm:$0xf]  ;;  %v125_v6 = vld [vmem:[#allocation12 + $0x20] sm:$0xff]  ;;  %v126_v7 = vld [vmem:[#allocation12 + $0x28] sm:$0xff]  ;;  %p4154_p6 = scmp.ne.s32.totalorder %s2612_s20, %s4153_s23  ;;  %p4159_p8 = scmp.lt.s32.totalorder %s4153_s23, %s4153_s23 }
  0x72   :  { %v4392_v19 = vpack.c.bf16 %v247_v14, %v240_v13  ;;  %3484 = vmatprep.subr.bf16.mxu1 %v4382_v12  ;;  %v4395_v20 = vand.u32 4294901760, %v147_v11  ;;  %v241_v21 = vand.u32 4294901760, %v240_v13  ;;  %v248_v24 = vand.u32 4294901760, %v247_v14  ;;  %v4492_v8 = vld [vmem:[#allocation12 + $0x30] sm:$0xff] }
  0x73   :  { %v4399_v22 = vpack.c.bf16 %v4388_v17, %v4384_v15  ;;  %3486 = vmatpush3.bf16.msra.mxu1 %v4382_v12  ;;  %v219_v23 = vsub.f32 %v144_v10, %v4390_v18  ;;  %v255_v25 = vand.u32 4294901760, %v4384_v15  ;;  %v262_v28 = vand.u32 4294901760, %v4388_v17  ;;  %p4160_p9 = por %p4159_p8, %p4158_p7 }
  0x74   :  { %3500 = vmatprep.subr.bf16.mxu0 %v4392_v19  ;;  %v229_v26 = vsub.f32 %v147_v11, %v4395_v20  ;;  %3488 = vmatprep.subr.bf16.mxu1 %v4386_v16  ;;  %v242_v27 = vsub.f32 %v240_v13, %v241_v21  ;;  %v249_v30 = vsub.f32 %v247_v14, %v248_v24  ;;  %v691_v45 = vand.u32 4294901760, %v4413_v38  ;;  %v4494_v11 = vld [vmem:[#allocation12 + $0x38] sm:$0xff] }
  0x75   :  { %3502 = vmatpush3.bf16.msra.mxu0 %v4392_v19  ;;  %2961 = vmatprep.mubr.f32.mxu0 %v219_v23  ;;  %v220_v29 = vand.u32 4294901760, %v219_v23  ;;  %v256_v31 = vsub.f32 %v4384_v15, %v255_v25  ;;  %v263_v34 = vsub.f32 %v4388_v17, %v262_v28  ;;  %v694_v46 = vand.u32 4294901760, %v4415_v39  ;;  %v4512_v17 = vld [vmem:[#allocation12 + $0x48] sm:$0xff]  ;;  %p4161_p10 = pnand %p4160_p9, %p4154_p6 }
  0x76   :  { %3504 = vmatprep.subr.bf16.mxu0 %v4399_v22  ;;  %v230_v32 = vand.u32 4294901760, %v229_v26  ;;  %v243_v33 = vand.u32 4294901760, %v242_v27  ;;  %v250_v36 = vand.u32 4294901760, %v249_v30  ;;  %v4431_v51 = vpack.c.bf16 %v248_v24, %v241_v21  ;;  %v4522_v21 = vld [vmem:[#allocation12 + $0x50] sm:$0xff]  ;;  %v4538_v27 = vld [vmem:[#allocation12 + $0x68] sm:$0xff] }
  0x77   :  { %3490 = vmatpush3.bf16.msra.mxu1 %v4386_v16  ;;  %v221_v35 = vsub.f32 %v219_v23, %v220_v29  ;;  %v257_v37 = vand.u32 4294901760, %v256_v31  ;;  %v264_v41 = vand.u32 4294901760, %v263_v34  ;;  %v1381_v52 = vsel %vm142_vm0, %v1376_v48, 0  ;;  %v4562_v34 = vld [vmem:[#allocation12 + $0x78] sm:$0xff] }
  0x78   :  { %v231_v40 = vsub.f32 %v229_v26, %v230_v32  ;;  %v4418_v43 = vpack.c.bf16 %v250_v36, %v243_v33  ;;  %v4438_v53 = vpack.c.bf16 %v694_v46, %v691_v45  ;;  %v697_v54 = vand.u32 4294901760, %v4424_v49  ;;  %v4560_v33 = vld [vmem:[#allocation12 + $0x70] sm:$0xff] }
  0x79   :  { %3506 = vmatpush3.bf16.msra.mxu0 %v4399_v22  ;;  %v222_v42 = vand.u32 4294901760, %v221_v35  ;;  %v3495_v47 = vpack.c.bf16 %v264_v41, %v257_v37  ;;  %v700_v55 = vand.u32 4294901760, %v4426_v50  ;;  %v4444_v56 = vand.u32 4294901760, %v1381_v52 }
  0x7a   :  { %3508 = vmatprep.subr.bf16.mxu0 %v4382_v12  ;;  %v232_v44 = vand.u32 4294901760, %v231_v40  ;;  %3492 = vmatprep.subr.bf16.mxu1 %v4418_v43  ;;  %v3519_v58 = vpack.c.bf16 %v262_v28, %v255_v25  ;;  %v1384_v60 = vsel %vm142_vm0, %v1377_v57, 0  ;;  %v703_v9 = vand.u32 4294901760, %v125_v6 }
  0x7b   :  { %2939 = vmatprep.mubr.f32.mxu1 %v222_v42  ;;  %v4452_v59 = vpack.c.bf16 %v700_v55, %v697_v54  ;;  %v1456_v61 = vsub.f32 %v1381_v52, %v4444_v56  ;;  %v1465_v62 = vand.u32 4294901760, %v1384_v60  ;;  %v706_v10 = vand.u32 4294901760, %v126_v7 }
  0x7c   :  { %2962 = vmatmul.mubr.f32.vlgmr.msra.gmra.mrb[0].mxu0 %v229_v26  ;;  %2940 = vmatmul.mubr.f32.vlgmr.msra.gmra.mrb[0].mxu1 %v232_v44  ;;  %v709_v13 = vand.u32 4294901760, %v4492_v8  ;;  %v712_v14 = vand.u32 4294901760, %v4494_v11  ;;  %v721_v23 = vand.u32 4294901760, %v4522_v21  ;;  %v4536_v26 = vld [vmem:[#allocation12 + $0x60] sm:$0xff]  ;;  %v4553_v31 = vsub.f32 %v4413_v38, %v691_v45 }
  0x7d   :  { %3510 = vmatpush3.bf16.msra.mxu0 %v4382_v12  ;;  %3494 = vmatpush3.bf16.msra.mxu1 %v4418_v43  ;;  %v1457_v63 = vand.u32 4294901760, %v1456_v61  ;;  %v1466_v0 = vsub.f32 %v1384_v60, %v1465_v62  ;;  %v727_v28 = vand.u32 4294901760, %v4536_v26  ;;  %v733_v35 = vand.u32 4294901760, %v4560_v33 }
  0x7e   :  { %3512 = vmatprep.subr.bf16.mxu0 %v4386_v16  ;;  %2972 = vmatprep.mubr.f32.mxu0 %v220_v29  ;;  %v4504_v15 = vpack.c.bf16 %v712_v14, %v709_v13  ;;  %v730_v29 = vand.u32 4294901760, %v4538_v27  ;;  %v736_v36 = vand.u32 4294901760, %v4562_v34  ;;  %v794_v37 = vand.u32 4294901760, %v4553_v31 }
  0x7f   :  { %3496 = vmatprep.subr.bf16.mxu1 %v3495_v47  ;;  %2950 = vmatprep.mubr.f32.mxu1 %v4390_v18  ;;  %v1458_v1 = vsub.f32 %v1456_v61, %v1457_v63  ;;  %v1467_v2 = vand.u32 4294901760, %v1466_v0  ;;  %v4585_v42 = vsub.f32 %v4424_v49, %v697_v54  ;;  %v4606_v52 = vsub.f32 %v126_v7, %v706_v10 }
  0x80   :  { %v4548_v30 = vpack.c.bf16 %v730_v29, %v727_v28  ;;  %v795_v40 = vsub.f32 %v4553_v31, %v794_v37 }
  0x81   :  { %3514 = vmatpush3.bf16.msra.mxu0 %v4386_v16  ;;  %3498 = vmatpush3.bf16.msra.mxu1 %v3495_v47  ;;  %v1459_v3 = vand.u32 4294901760, %v1458_v1  ;;  %v1468_v4 = vsub.f32 %v1466_v0, %v1467_v2  ;;  %v829_v57 = vand.u32 4294901760, %v4606_v52 }
  0x82   :  { %3516 = vmatprep.subr.bf16.mxu0 %v4431_v51  ;;  %3532 = vmatprep.subr.bf16.mxu1 %v4438_v53  ;;  %v796_v44 = vand.u32 4294901760, %v795_v40 }
  0x83   :  { %v1469_v5 = vand.u32 4294901760, %v1468_v4 }
  0x84   :  { %2973 = vmatmul.mubr.f32.vlgmr.msra.gmra.mrb[0].mxu0 %v230_v32  ;;  %2951 = vmatmul.mubr.f32.vlgmr.msra.gmra.mrb[0].mxu1 %v4395_v20  ;;  %v4558_v32 = vsub.f32 %v4415_v39, %v694_v46  ;;  %v4574_v39 = vpack.c.bf16 %v736_v36, %v733_v35  ;;  %v808_v46 = vand.u32 4294901760, %v4585_v42 }
  0x85   :  { %3518 = vmatpush3.bf16.msra.mxu0 %v4431_v51  ;;  %2983 = vmatprep.mubr.f32.mxu0 %v4390_v18 }
  0x86   :  { %3520 = vmatprep.subr.bf16.mxu0 %v3519_v58  ;;  %3534 = vmatpush3.bf16.msra.mxu1 %v4438_v53  ;;  %v801_v38 = vand.u32 4294901760, %v4558_v32  ;;  %v809_v49 = vsub.f32 %v4585_v42, %v808_v46 }
  0x87   :  { %3536 = vmatprep.subr.bf16.mxu1 %v4452_v59 }
  0x88   :  { %v802_v41 = vsub.f32 %v4558_v32, %v801_v38  ;;  %v810_v54 = vand.u32 4294901760, %v809_v49 }
  0x89   :  { %3522 = vmatpush3.bf16.msra.mxu0 %v3519_v58 }
  0x8a   :  { %3524 = vmatprep.subr.bf16.mxu0 %v4382_v12  ;;  %3538 = vmatpush3.bf16.msra.mxu1 %v4452_v59  ;;  %v803_v45 = vand.u32 4294901760, %v802_v41 }
  0x8c   :  { %2984 = vmatmul.mubr.f32.vlgmr.msra.gmra.mrb[0].mxu0 %v4395_v20  ;;  %v4596_v48 = vpack.c.bf16 %v803_v45, %v796_v44 }
  0x8d   :  { %3526 = vmatpush3.bf16.msra.mxu0 %v4382_v12  ;;  %2994 = vmatprep.mubr.f32.mxu0 %v4390_v18 }
  0x8e   :  { %3528 = vmatprep.subr.bf16.mxu0 %v4386_v16 }
  0x91   :  { %3530 = vmatpush3.bf16.msra.mxu0 %v4386_v16 }
  0x92   :  { %3724 = vmatprep.subr.bf16.mxu0 %v4382_v12 }
  0x94   :  { %2995 = vmatmul.mubr.f32.vlgmr.msra.gmra.mrb[0].mxu0 %v4395_v20 }
  0x95   :  { %3726 = vmatpush3.bf16.msra.mxu0 %v4382_v12  ;;  %3215 = vmatprep.mubr.f32.mxu0 %v1459_v3 }
  0x96   :  { %3728 = vmatprep.subr.bf16.mxu0 %v4386_v16 }
  0x99   :  { %3730 = vmatpush3.bf16.msra.mxu0 %v4386_v16 }
  0x9a   :  { %3732 = vmatprep.subr.bf16.mxu0 %v4418_v43 }
  0x9c   :  { %3216 = vmatmul.mubr.f32.vlgmr.msra.gmra.mrb[2].mxu0 %v1469_v5 }
  0x9d   :  { %3734 = vmatpush3.bf16.msra.mxu0 %v4418_v43  ;;  %3226 = vmatprep.mubr.f32.mxu0 %v4444_v56  ;;  %v4590_v43 = vsub.f32 %v4426_v50, %v700_v55 }
  0x9e   :  { %3736 = vmatprep.subr.bf16.mxu0 %v3495_v47 }
  0xa1   :  { %3738 = vmatpush3.bf16.msra.mxu0 %v3495_v47  ;;  %v815_v47 = vand.u32 4294901760, %v4590_v43 }
  0xa2   :  { %3740 = vmatprep.subr.bf16.mxu0 %v4392_v19 }
  0xa3   :  { %v816_v50 = vsub.f32 %v4590_v43, %v815_v47 }
  0xa4   :  { %3227 = vmatmul.mubr.f32.vlgmr.msra.gmra.mrb[2].mxu0 %v1465_v62 }
  0xa5   :  { %3742 = vmatpush3.bf16.msra.mxu0 %v4392_v19  ;;  %3237 = vmatprep.mubr.f32.mxu0 %v1456_v61  ;;  %v718_v19 = vand.u32 4294901760, %v4512_v17  ;;  %v817_v55 = vand.u32 4294901760, %v816_v50  ;;  %v830_v61 = vsub.f32 %v4606_v52, %v829_v57 }
  0xa6   :  { %3744 = vmatprep.subr.bf16.mxu0 %v4399_v22 }
  0xa7   :  { %v831_v1 = vand.u32 4294901760, %v830_v61  ;;  %v4648_v7 = vsub.f32 %v4512_v17, %v718_v19  ;;  %v4666_v17 = vsub.f32 %v4522_v21, %v721_v23 }
  0xa9   :  { %3746 = vmatpush3.bf16.msra.mxu0 %v4399_v22  ;;  %v4524_v22 = vld [vmem:[#allocation12 + $0x58] sm:$0xff]  ;;  %v5024_v44 = vand.u32 4294901760, %v4666_v17 }
  0xaa   :  { %3748 = vmatprep.subr.bf16.mxu0 %v4382_v12  ;;  %v724_v24 = vand.u32 4294901760, %v4524_v22 }
  0xab   :  { %v865_v21 = vsub.f32 %v4666_v17, %v5024_v44 }
  0xac   :  { %3238 = vmatmul.mubr.f32.vlgmr.msra.gmra.mrb[2].mxu0 %v1466_v0  ;;  %v4534_v25 = vpack.c.bf16 %v724_v24, %v721_v23  ;;  %v4690_v23 = vsub.f32 %v4536_v26, %v727_v28  ;;  %v4714_v28 = vsub.f32 %v4562_v34, %v736_v36 }
  0xad   :  { %3750 = vmatpush3.bf16.msra.mxu0 %v4382_v12  ;;  %3248 = vmatprep.mubr.f32.mxu0 %v1457_v63  ;;  %v4629_v63 = vsub.f32 %v4494_v11, %v712_v14  ;;  %v5025_v11 = vand.u32 4294901760, %v4648_v7  ;;  %v866_v50 = vand.u32 4294901760, %v865_v21 }
  0xae   :  { %3752 = vmatprep.subr.bf16.mxu0 %v4386_v16 }
  0xaf   :  { %v5027_v3 = vand.u32 4294901760, %v4629_v63 }
  0xb1   :  { %3754 = vmatpush3.bf16.msra.mxu0 %v4386_v16 }
  0xb2   :  { %3756 = vmatprep.subr.bf16.mxu0 %v4431_v51 }
  0xb4   :  { %3249 = vmatmul.mubr.f32.vlgmr.msra.gmra.mrb[2].mxu0 %v1467_v2 }
  0xb5   :  { %3758 = vmatpush3.bf16.msra.mxu0 %v4431_v51  ;;  %3259 = vmatprep.mubr.f32.mxu0 %v4444_v56  ;;  %v4604_v51 = vsub.f32 %v125_v6, %v703_v9 }
  0xb6   :  { %3760 = vmatprep.subr.bf16.mxu0 %v3519_v58 }
  0xb9   :  { %3762 = vmatpush3.bf16.msra.mxu0 %v3519_v58  ;;  %v4613_v58 = vpack.c.bf16 %v817_v55, %v810_v54  ;;  %v5022_v55 = vand.u32 4294901760, %v4690_v23 }
  0xba   :  { %3764 = vmatprep.subr.bf16.mxu0 %v4382_v12 }
  0xbb   :  { %v879_v26 = vsub.f32 %v4690_v23, %v5022_v55 }
  0xbc   :  { %3260 = vmatmul.mubr.f32.vlgmr.msra.gmra.mrb[2].mxu0 %v1465_v62 }
  0xbd   :  { %3766 = vmatpush3.bf16.msra.mxu0 %v4382_v12  ;;  %3270 = vmatprep.mubr.f32.mxu0 %v4444_v56  ;;  %v4498_v12 = vpack.c.bf16 %v706_v10, %v703_v9  ;;  %v822_v56 = vand.u32 4294901760, %v4604_v51 }
  0xbe   :  { %3768 = vmatprep.subr.bf16.mxu0 %v4386_v16 }
  0xbf   :  { %3540 = vmatprep.subr.bf16.mxu1 %v4498_v12  ;;  %v823_v60 = vsub.f32 %v4604_v51, %v822_v56 }
  0xc0   :  { %3542 = vmatpush3.bf16.msra.mxu1 %v4498_v12 }
  0xc1   :  { %3770 = vmatpush3.bf16.msra.mxu0 %v4386_v16  ;;  %3544 = vmatprep.subr.bf16.mxu1 %v4504_v15  ;;  %v4510_v16 = vld [vmem:[#allocation12 + $0x40] sm:$0xff]  ;;  %v824_v0 = vand.u32 4294901760, %v823_v60 }
  0xc2   :  { %v715_v18 = vand.u32 4294901760, %v4510_v16  ;;  %3804 = vmatprep.subr.bf16.mxu0 %v4596_v48 }
  0xc3   :  { %v4635_v4 = vpack.c.bf16 %v831_v1, %v824_v0  ;;  %v880_v0 = vand.u32 4294901760, %v879_v26 }
  0xc4   :  { %3271 = vmatmul.mubr.f32.vlgmr.msra.gmra.mrb[2].mxu0 %v1465_v62  ;;  %3546 = vmatpush3.bf16.msra.mxu1 %v4504_v15  ;;  %v4520_v20 = vpack.c.bf16 %v718_v19, %v715_v18  ;;  %v4624_v62 = vsub.f32 %v4492_v8, %v709_v13  ;;  %v4643_v6 = vsub.f32 %v4510_v16, %v715_v18 }
  0xc5   :  { %3806 = vmatpush3.bf16.msra.mxu0 %v4596_v48  ;;  %v844_v8 = vsub.f32 %v4629_v63, %v5027_v3  ;;  %v858_v16 = vsub.f32 %v4648_v7, %v5025_v11  ;;  %v4671_v18 = vsub.f32 %v4524_v22, %v724_v24  ;;  %v4695_v24 = vsub.f32 %v4538_v27, %v730_v29 }
  0xc6   :  { %3548 = vmatprep.subr.bf16.mxu1 %v4520_v20  ;;  %v836_v2 = vand.u32 4294901760, %v4624_v62  ;;  %3808 = vmatprep.subr.bf16.mxu0 %v4613_v58  ;;  %v5026_v10 = vand.u32 4294901760, %v4643_v6  ;;  %v4709_v27 = vsub.f32 %v4560_v33, %v733_v35  ;;  %v4748_v21 = vpack.c.bf16 %v4648_v7, %v4643_v6 }
  0xc7   :  { %v845_v13 = vand.u32 4294901760, %v844_v8  ;;  %v859_v41 = vand.u32 4294901760, %v858_v16  ;;  %v5023_v45 = vand.u32 4294901760, %v4671_v18  ;;  %v5021_v60 = vand.u32 4294901760, %v4695_v24 }
  0xc8   :  { %3550 = vmatpush3.bf16.msra.mxu1 %v4520_v20  ;;  %v837_v5 = vsub.f32 %v4624_v62, %v836_v2  ;;  %v851_v14 = vsub.f32 %v4643_v6, %v5026_v10  ;;  %v5020_v1 = vand.u32 4294901760, %v4709_v27  ;;  %v4736_v16 = vpack.c.bf16 %v4590_v43, %v4585_v42 }
  0xc9   :  { %3552 = vmatprep.subr.bf16.mxu1 %v4534_v25  ;;  %3810 = vmatpush3.bf16.msra.mxu0 %v4613_v58  ;;  %v872_v22 = vsub.f32 %v4671_v18, %v5023_v45  ;;  %v886_v29 = vsub.f32 %v4695_v24, %v5021_v60  ;;  %v5030_v42 = vand.u32 4294901760, %v4648_v7 }
  0xca   :  { %v838_v9 = vand.u32 4294901760, %v837_v5  ;;  %3812 = vmatprep.subr.bf16.mxu0 %v4635_v4  ;;  %v852_v40 = vand.u32 4294901760, %v851_v14  ;;  %v5019_v5 = vand.u32 4294901760, %v4714_v28  ;;  %v893_v33 = vsub.f32 %v4709_v27, %v5020_v1 }
  0xcb   :  { %v873_v54 = vand.u32 4294901760, %v872_v22  ;;  %v887_v8 = vand.u32 4294901760, %v886_v29  ;;  %v4731_v14 = vpack.c.bf16 %v4558_v32, %v4553_v31  ;;  %v4752_v22 = vpack.c.bf16 %v4671_v18, %v4666_v17 }
  0xcc   :  { %3554 = vmatpush3.bf16.msra.mxu1 %v4534_v25  ;;  %v4673_v19 = vpack.c.bf16 %v845_v13, %v838_v9  ;;  %v4678_v49 = vpack.c.bf16 %v859_v41, %v852_v40  ;;  %v900_v34 = vsub.f32 %v4714_v28, %v5019_v5  ;;  %v894_v36 = vand.u32 4294901760, %v893_v33 }
  0xcd   :  { %3556 = vmatprep.subr.bf16.mxu1 %v4548_v30  ;;  %3814 = vmatpush3.bf16.msra.mxu0 %v4635_v4  ;;  %v4700_v61 = vpack.c.bf16 %v873_v54, %v866_v50  ;;  %v3587_v35 = vpack.c.bf16 %v887_v8, %v880_v0  ;;  %v4740_v40 = vpack.c.bf16 %v4606_v52, %v4604_v51  ;;  %v141_v0 = vld [vmem:[#allocation8 + $0x8] sm:$0xff]  ;;  %v140_v8 = vld [vmem:[#allocation8] sm:$0xff]  ;;  %v5028_v32 = vand.u32 4294901760, %v4629_v63 }
  0xce   :  { %3816 = vmatprep.subr.bf16.mxu0 %v4673_v19  ;;  %v901_v9 = vand.u32 4294901760, %v900_v34  ;;  %v4744_v41 = vpack.c.bf16 %v4629_v63, %v4624_v62  ;;  %v4756_v50 = vpack.c.bf16 %v4695_v24, %v4690_v23  ;;  %v4760_v54 = vpack.c.bf16 %v4714_v28, %v4709_v27 }
  0xcf   :  { %v3667_v31 = vpack.c.bf16 %v829_v57, %v822_v56  ;;  %v5033_v52 = vand.u32 4294901760, %v4690_v23  ;;  %v5034_v56 = vand.u32 4294901760, %v4695_v24  ;;  %v5035_v62 = vand.u32 4294901760, %v4709_v27 }
  0xd0   :  { %3558 = vmatpush3.bf16.msra.mxu1 %v4548_v30  ;;  %v3591_v13 = vpack.c.bf16 %v901_v9, %v894_v36  ;;  %v679_v9 = vstv %s5016_s7  ;;  %v5036_v63 = vand.u32 4294901760, %v4714_v28 }
  0xd1   :  { %3560 = vmatprep.subr.bf16.mxu1 %v4574_v39  ;;  %3818 = vmatpush3.bf16.msra.mxu0 %v4673_v19  ;;  %v3683_v57 = vpack.c.bf16 %v5034_v56, %v5033_v52 }
  0xd2   :  { %3820 = vmatprep.subr.bf16.mxu0 %v4678_v49 }
  0xd4   :  { %3562 = vmatpush3.bf16.msra.mxu1 %v4574_v39 }
  0xd5   :  { %3564 = vmatprep.subr.bf16.mxu1 %v4596_v48  ;;  %3822 = vmatpush3.bf16.msra.mxu0 %v4678_v49 }
  0xd6   :  { %3824 = vmatprep.subr.bf16.mxu0 %v4700_v61 }
  0xd9   :  { %3826 = vmatpush3.bf16.msra.mxu0 %v4700_v61 }
  0xda   :  { %3828 = vmatprep.subr.bf16.mxu0 %v3587_v35 }
  0xdd   :  { %3830 = vmatpush3.bf16.msra.mxu0 %v3587_v35 }
  0xde   :  { %3832 = vmatprep.subr.bf16.mxu0 %v3591_v13 }
  0xe1   :  { %3834 = vmatpush3.bf16.msra.mxu0 %v3591_v13 }
  0xe2   :  { %3836 = vmatprep.subr.bf16.mxu0 %v4731_v14 }
 0x157   :  { %v2952_v26 = vpop.f32.mrb[0].mxu1 }
 0x158   :  { %v325_v29 = vpop.f32.mrb[1].mxu1  ;;  %v3963_v33 = vadd.f32 %v2952_v26, %v141_v0 }
 0x159   :  { %v3965_v34 = vadd.f32 %v325_v29, %v140_v8 }
 0x167   :  { %v2996_v36 = vpop.f32.mrb[0].mxu0 }
 0x168   :  { %v3964_v5 = vadd.f32 %v3963_v33, %v2996_v36  ;;  %v667_v1 = vpop.f32.mrb[1].mxu0 }
 0x169   :  { %v3966_v60 = vadd.f32 %v3965_v34, %v667_v1 }
 0x16a   :  { %vm678_vm1 = vcmp.gt.f32.partialorder %v3964_v5, 0.0  ;;  %v681_v55 = vmul.f32 %v3964_v5, %v679_v9 }
 0x16b   :  { %vm677_vm2 = vcmp.gt.f32.partialorder %v3966_v60, 0.0  ;;  %v680_v45 = vmul.f32 %v3966_v60, %v679_v9 }
 0x16c   :  { %v683_v44 = vsel %vm678_vm1, %v3964_v5, %v681_v55 }
 0x16d   :  { %v4765_v11 = vand.u32 4294901760, %v683_v44  ;;  %v682_v10 = vsel %vm677_vm2, %v3966_v60, %v680_v45 }
 0x16e   :  { %v4767_v3 = vand.u32 4294901760, %v682_v10 }
 0x16f   :  { %v4770_v26 = vsub.f32 %v683_v44, %v4765_v11 }
 0x170   :  { %v4773_v29 = vsub.f32 %v682_v10, %v4767_v3 }
 0x171   :  { %v783_v0 = vand.u32 4294901760, %v4770_v26 }
 0x172   :  { %v773_v1 = vand.u32 4294901760, %v4773_v29 }
 0x173   :  { %v784_v8 = vsub.f32 %v4770_v26, %v783_v0 }
 0x174   :  { %v774_v45 = vsub.f32 %v4773_v29, %v773_v1 }
 0x175   :  { %v785_v60 = vand.u32 4294901760, %v784_v8 }
 0x176   :  { %v775_v55 = vand.u32 4294901760, %v774_v45 }
 0x178   :  { %3029 = vmatprep.mubr.f32.mxu1 %v775_v55 }
 0x179   :  { %3030 = vmatmul.mubr.f32.vlgmr.msra.gmra.mrb[2].mxu1 %v785_v60 }
 0x17a   :  { %3566 = vmatpush3.bf16.msra.mxu1 %v4596_v48  ;;  %3064 = vmatprep.mubr.f32.mxu1 %v4767_v3  ;;  %v1379_v48 = vld [vmem:[#allocation9 + $0x8] sm:$0xf] }
 0x17b   :  { %3568 = vmatprep.subr.bf16.mxu1 %v4613_v58 }
 0x17e   :  { %3570 = vmatpush3.bf16.msra.mxu1 %v4613_v58  ;;  %v1378_v58 = vld [vmem:[#allocation9] sm:$0xff] }
 0x17f   :  { %3572 = vmatprep.subr.bf16.mxu1 %v4635_v4 }
 0x182   :  { %3574 = vmatpush3.bf16.msra.mxu1 %v4635_v4 }
 0x183   :  { %3576 = vmatprep.subr.bf16.mxu1 %v4673_v19 }
 0x186   :  { %3578 = vmatpush3.bf16.msra.mxu1 %v4673_v19 }
 0x187   :  { %3580 = vmatprep.subr.bf16.mxu1 %v4678_v49 }
 0x18a   :  { %3582 = vmatpush3.bf16.msra.mxu1 %v4678_v49 }
 0x18b   :  { %3584 = vmatprep.subr.bf16.mxu1 %v4700_v61 }
 0x18e   :  { %3586 = vmatpush3.bf16.msra.mxu1 %v4700_v61 }
 0x18f   :  { %3588 = vmatprep.subr.bf16.mxu1 %v3587_v35 }
 0x192   :  { %3590 = vmatpush3.bf16.msra.mxu1 %v3587_v35 }
 0x193   :  { %3592 = vmatprep.subr.bf16.mxu1 %v3591_v13 }
 0x196   :  { %3594 = vmatpush3.bf16.msra.mxu1 %v3591_v13 }
 0x197   :  { %v3272_v10 = vpop.f32.mrb[2].mxu0  ;;  %3596 = vmatprep.subr.bf16.mxu1 %v4731_v14 }
 0x198   :  { %v3969_v4 = vadd.f32 %v3272_v10, %v1379_v48  ;;  %v1904_v44 = vpop.f32.mrb[3].mxu0 }
 0x199   :  { %3065 = vmatmul.mubr.f32.vlgmr.msra.gmra.mrb[2].mxu1 %v4765_v11  ;;  %v3970_v19 = vadd.f32 %v1904_v44, %v1378_v58 }
 0x19a   :  { %vm1915_vm3 = vcmp.gt.f32.partialorder %v3969_v4, 0.0  ;;  %v1917_v49 = vmul.f32 %v3969_v4, %v679_v9  ;;  %3598 = vmatpush3.bf16.msra.mxu1 %v4731_v14  ;;  %3099 = vmatprep.mubr.f32.mxu1 %v4773_v29 }
 0x19b   :  { %vm1914_vm4 = vcmp.gt.f32.partialorder %v3970_v19, 0.0  ;;  %v1916_v61 = vmul.f32 %v3970_v19, %v679_v9  ;;  %3600 = vmatprep.subr.bf16.mxu1 %v4736_v16 }
 0x19c   :  { %v1919_v5 = vsel %vm1915_vm3, %v3969_v4, %v1917_v49 }
 0x19d   :  { %v4800_v35 = vand.u32 4294901760, %v1919_v5  ;;  %v1918_v13 = vsel %vm1914_vm4, %v3970_v19, %v1916_v61 }
 0x19e   :  { %v4802_v33 = vand.u32 4294901760, %v1918_v13  ;;  %3602 = vmatpush3.bf16.msra.mxu1 %v4736_v16 }
 0x19f   :  { %v4806_v34 = vsub.f32 %v1919_v5, %v4800_v35  ;;  %3604 = vmatprep.subr.bf16.mxu1 %v4740_v40 }
 0x1a0   :  { %3340 = vmatprep.mubr.f32.mxu0 %v4802_v33  ;;  %v2002_v36 = vsub.f32 %v1918_v13, %v4802_v33 }
 0x1a1   :  { %3341 = vmatmul.mubr.f32.vlgmr.msra.gmra.mrb[4].mxu0 %v4800_v35  ;;  %v2013_v9 = vand.u32 4294901760, %v4806_v34 }
 0x1a2   :  { %3606 = vmatpush3.bf16.msra.mxu1 %v4740_v40  ;;  %3838 = vmatpush3.bf16.msra.mxu0 %v4731_v14  ;;  %v2003_v8 = vand.u32 4294901760, %v2002_v36  ;;  %v3659_v14 = vpack.c.bf16 %v801_v38, %v794_v37  ;;  %v3671_v37 = vpack.c.bf16 %v5028_v32, %v836_v2  ;;  %v5029_v38 = vand.u32 4294901760, %v4643_v6 }
 0x1a3   :  { %3375 = vmatprep.mubr.f32.mxu0 %v2002_v36  ;;  %3608 = vmatprep.subr.bf16.mxu1 %v4744_v41  ;;  %v4819_v45 = vsub.f32 %v4806_v34, %v2013_v9  ;;  %v3687_v2 = vpack.c.bf16 %v5036_v63, %v5035_v62 }
 0x1a4   :  { %3840 = vmatprep.subr.bf16.mxu0 %v4736_v16  ;;  %v4822_v55 = vsub.f32 %v2002_v36, %v2003_v8  ;;  %v3675_v43 = vpack.c.bf16 %v5030_v42, %v5029_v38 }
 0x1a6   :  { %3610 = vmatpush3.bf16.msra.mxu1 %v4744_v41  ;;  %3842 = vmatpush3.bf16.msra.mxu0 %v4736_v16  ;;  %v3663_v16 = vpack.c.bf16 %v815_v47, %v808_v46  ;;  %v5031_v46 = vand.u32 4294901760, %v4666_v17  ;;  %v5032_v47 = vand.u32 4294901760, %v4671_v18 }
 0x1a7   :  { %3612 = vmatprep.subr.bf16.mxu1 %v4748_v21  ;;  %3844 = vmatprep.subr.bf16.mxu0 %v4740_v40 }
 0x1a8   :  { %v3679_v51 = vpack.c.bf16 %v5032_v47, %v5031_v46 }
 0x1aa   :  { %3614 = vmatpush3.bf16.msra.mxu1 %v4748_v21  ;;  %3846 = vmatpush3.bf16.msra.mxu0 %v4740_v40 }
 0x1ab   :  { %3616 = vmatprep.subr.bf16.mxu1 %v4752_v22  ;;  %3848 = vmatprep.subr.bf16.mxu0 %v4744_v41 }
 0x1ae   :  { %3618 = vmatpush3.bf16.msra.mxu1 %v4752_v22  ;;  %3850 = vmatpush3.bf16.msra.mxu0 %v4744_v41 }
 0x1af   :  { %3620 = vmatprep.subr.bf16.mxu1 %v4756_v50  ;;  %3852 = vmatprep.subr.bf16.mxu0 %v4748_v21 }
 0x1b2   :  { %3622 = vmatpush3.bf16.msra.mxu1 %v4756_v50  ;;  %3854 = vmatpush3.bf16.msra.mxu0 %v4748_v21 }
 0x1b3   :  { %3624 = vmatprep.subr.bf16.mxu1 %v4760_v54  ;;  %3856 = vmatprep.subr.bf16.mxu0 %v4752_v22 }
 0x1b6   :  { %3626 = vmatpush3.bf16.msra.mxu1 %v4760_v54  ;;  %3858 = vmatpush3.bf16.msra.mxu0 %v4752_v22 }
 0x1b7   :  { %3628 = vmatprep.subr.bf16.mxu1 %v4438_v53  ;;  %3860 = vmatprep.subr.bf16.mxu0 %v4756_v50 }
 0x1b9   :  { %3100 = vmatmul.mubr.f32.vlgmr.msra.gmra.mrb[2].mxu1 %v4770_v26 }
 0x1ba   :  { %3630 = vmatpush3.bf16.msra.mxu1 %v4438_v53  ;;  %3134 = vmatprep.mubr.f32.mxu1 %v773_v1 }
 0x1bb   :  { %3862 = vmatpush3.bf16.msra.mxu0 %v4756_v50  ;;  %3632 = vmatprep.subr.bf16.mxu1 %v4452_v59 }
 0x1bc   :  { %3864 = vmatprep.subr.bf16.mxu0 %v4760_v54 }
 0x1be   :  { %3634 = vmatpush3.bf16.msra.mxu1 %v4452_v59 }
 0x1bf   :  { %3866 = vmatpush3.bf16.msra.mxu0 %v4760_v54  ;;  %3636 = vmatprep.subr.bf16.mxu1 %v4498_v12 }
 0x1c0   :  { %3868 = vmatprep.subr.bf16.mxu0 %v4438_v53 }
 0x1c2   :  { %3376 = vmatmul.mubr.f32.vlgmr.msra.gmra.mrb[4].mxu0 %v4806_v34  ;;  %3638 = vmatpush3.bf16.msra.mxu1 %v4498_v12 }
 0x1c3   :  { %3870 = vmatpush3.bf16.msra.mxu0 %v4438_v53  ;;  %3410 = vmatprep.mubr.f32.mxu0 %v2003_v8 }
 0x1c4   :  { %3640 = vmatprep.subr.bf16.mxu1 %v4504_v15  ;;  %3872 = vmatprep.subr.bf16.mxu0 %v4452_v59 }
 0x1c6   :  { %3642 = vmatpush3.bf16.msra.mxu1 %v4504_v15 }
 0x1c7   :  { %3874 = vmatpush3.bf16.msra.mxu0 %v4452_v59  ;;  %3644 = vmatprep.subr.bf16.mxu1 %v4520_v20 }
 0x1c8   :  { %3876 = vmatprep.subr.bf16.mxu0 %v4498_v12 }
 0x1ca   :  { %3646 = vmatpush3.bf16.msra.mxu1 %v4520_v20 }
 0x1cb   :  { %3878 = vmatpush3.bf16.msra.mxu0 %v4498_v12  ;;  %3648 = vmatprep.subr.bf16.mxu1 %v4534_v25 }
 0x1cc   :  { %3880 = vmatprep.subr.bf16.mxu0 %v4504_v15 }
 0x1ce   :  { %3650 = vmatpush3.bf16.msra.mxu1 %v4534_v25 }
 0x1cf   :  { %3882 = vmatpush3.bf16.msra.mxu0 %v4504_v15  ;;  %3652 = vmatprep.subr.bf16.mxu1 %v4548_v30 }
 0x1d0   :  { %3884 = vmatprep.subr.bf16.mxu0 %v4520_v20 }
 0x1d2   :  { %3654 = vmatpush3.bf16.msra.mxu1 %v4548_v30 }
 0x1d3   :  { %3886 = vmatpush3.bf16.msra.mxu0 %v4520_v20  ;;  %3656 = vmatprep.subr.bf16.mxu1 %v4574_v39 }
 0x1d4   :  { %3888 = vmatprep.subr.bf16.mxu0 %v4534_v25 }
 0x1d6   :  { %3658 = vmatpush3.bf16.msra.mxu1 %v4574_v39 }
 0x1d7   :  { %3890 = vmatpush3.bf16.msra.mxu0 %v4534_v25  ;;  %3660 = vmatprep.subr.bf16.mxu1 %v3659_v14 }
 0x1d8   :  { %3892 = vmatprep.subr.bf16.mxu0 %v4548_v30 }
 0x1d9   :  { %3135 = vmatmul.mubr.f32.vlgmr.msra.gmra.mrb[2].mxu1 %v783_v0 }
 0x1da   :  { %3662 = vmatpush3.bf16.msra.mxu1 %v3659_v14  ;;  %3169 = vmatprep.mubr.f32.mxu1 %v4767_v3 }
 0x1db   :  { %3894 = vmatpush3.bf16.msra.mxu0 %v4548_v30  ;;  %3664 = vmatprep.subr.bf16.mxu1 %v3663_v16 }
 0x1dc   :  { %3896 = vmatprep.subr.bf16.mxu0 %v4574_v39 }
 0x1de   :  { %3666 = vmatpush3.bf16.msra.mxu1 %v3663_v16 }
 0x1df   :  { %3898 = vmatpush3.bf16.msra.mxu0 %v4574_v39  ;;  %3668 = vmatprep.subr.bf16.mxu1 %v3667_v31 }
 0x1e0   :  { %3900 = vmatprep.subr.bf16.mxu0 %v3659_v14 }
 0x1e2   :  { %3411 = vmatmul.mubr.f32.vlgmr.msra.gmra.mrb[4].mxu0 %v2013_v9  ;;  %3670 = vmatpush3.bf16.msra.mxu1 %v3667_v31 }
 0x1e3   :  { %3902 = vmatpush3.bf16.msra.mxu0 %v3659_v14  ;;  %3445 = vmatprep.mubr.f32.mxu0 %v4802_v33 }
 0x1e4   :  { %3672 = vmatprep.subr.bf16.mxu1 %v3671_v37  ;;  %3904 = vmatprep.subr.bf16.mxu0 %v3663_v16 }
 0x1e6   :  { %3674 = vmatpush3.bf16.msra.mxu1 %v3671_v37 }
 0x1e7   :  { %3906 = vmatpush3.bf16.msra.mxu0 %v3663_v16  ;;  %3676 = vmatprep.subr.bf16.mxu1 %v3675_v43 }
 0x1e8   :  { %3908 = vmatprep.subr.bf16.mxu0 %v3667_v31 }
 0x1ea   :  { %3678 = vmatpush3.bf16.msra.mxu1 %v3675_v43 }
 0x1eb   :  { %3910 = vmatpush3.bf16.msra.mxu0 %v3667_v31  ;;  %3680 = vmatprep.subr.bf16.mxu1 %v3679_v51 }
 0x1ec   :  { %3912 = vmatprep.subr.bf16.mxu0 %v3671_v37 }
 0x1ee   :  { %3682 = vmatpush3.bf16.msra.mxu1 %v3679_v51 }
 0x1ef   :  { %3914 = vmatpush3.bf16.msra.mxu0 %v3671_v37  ;;  %3684 = vmatprep.subr.bf16.mxu1 %v3683_v57 }
 0x1f0   :  { %3916 = vmatprep.subr.bf16.mxu0 %v3675_v43 }
 0x1f2   :  { %3686 = vmatpush3.bf16.msra.mxu1 %v3683_v57 }
 0x1f3   :  { %3918 = vmatpush3.bf16.msra.mxu0 %v3675_v43  ;;  %3688 = vmatprep.subr.bf16.mxu1 %v3687_v2 }
 0x1f4   :  { %3920 = vmatprep.subr.bf16.mxu0 %v3679_v51 }
 0x1f6   :  { %3690 = vmatpush3.bf16.msra.mxu1 %v3687_v2 }
 0x1f7   :  { %3922 = vmatpush3.bf16.msra.mxu0 %v3679_v51  ;;  %3692 = vmatprep.subr.bf16.mxu1 %v4438_v53 }
 0x1f8   :  { %3924 = vmatprep.subr.bf16.mxu0 %v3683_v57 }
 0x1f9   :  { %3170 = vmatmul.mubr.f32.vlgmr.msra.gmra.mrb[2].mxu1 %v4765_v11 }
 0x1fa   :  { %3694 = vmatpush3.bf16.msra.mxu1 %v4438_v53  ;;  %3204 = vmatprep.mubr.f32.mxu1 %v4767_v3  ;;  %v2005_v3 = vand.u32 4294901760, %v4822_v55 }
 0x1fb   :  { %3926 = vmatpush3.bf16.msra.mxu0 %v3683_v57  ;;  %3696 = vmatprep.subr.bf16.mxu1 %v4452_v59 }
 0x1fc   :  { %3928 = vmatprep.subr.bf16.mxu0 %v3687_v2 }
 0x1fe   :  { %3698 = vmatpush3.bf16.msra.mxu1 %v4452_v59 }
 0x1ff   :  { %3930 = vmatpush3.bf16.msra.mxu0 %v3687_v2  ;;  %3700 = vmatprep.subr.bf16.mxu1 %v4498_v12 }
 0x200   :  { %3932 = vmatprep.subr.bf16.mxu0 %v4438_v53 }
 0x202   :  { %3446 = vmatmul.mubr.f32.vlgmr.msra.gmra.mrb[4].mxu0 %v4800_v35  ;;  %3702 = vmatpush3.bf16.msra.mxu1 %v4498_v12 }
 0x203   :  { %3934 = vmatpush3.bf16.msra.mxu0 %v4438_v53  ;;  %3480 = vmatprep.mubr.f32.mxu0 %v4802_v33 }
 0x204   :  { %3704 = vmatprep.subr.bf16.mxu1 %v4504_v15  ;;  %3936 = vmatprep.subr.bf16.mxu0 %v4452_v59 }
 0x206   :  { %3706 = vmatpush3.bf16.msra.mxu1 %v4504_v15 }
 0x207   :  { %3938 = vmatpush3.bf16.msra.mxu0 %v4452_v59  ;;  %3708 = vmatprep.subr.bf16.mxu1 %v4520_v20 }
 0x208   :  { %3940 = vmatprep.subr.bf16.mxu0 %v4498_v12 }
 0x20a   :  { %3710 = vmatpush3.bf16.msra.mxu1 %v4520_v20 }
 0x20b   :  { %3942 = vmatpush3.bf16.msra.mxu0 %v4498_v12  ;;  %3712 = vmatprep.subr.bf16.mxu1 %v4534_v25 }
 0x20c   :  { %3944 = vmatprep.subr.bf16.mxu0 %v4504_v15 }
 0x20e   :  { %3714 = vmatpush3.bf16.msra.mxu1 %v4534_v25 }
 0x20f   :  { %3946 = vmatpush3.bf16.msra.mxu0 %v4504_v15  ;;  %3716 = vmatprep.subr.bf16.mxu1 %v4548_v30 }
 0x210   :  { %3948 = vmatprep.subr.bf16.mxu0 %v4520_v20 }
 0x212   :  { %3718 = vmatpush3.bf16.msra.mxu1 %v4548_v30 }
 0x213   :  { %3950 = vmatpush3.bf16.msra.mxu0 %v4520_v20  ;;  %3720 = vmatprep.subr.bf16.mxu1 %v4574_v39 }
 0x214   :  { %3952 = vmatprep.subr.bf16.mxu0 %v4534_v25 }
 0x216   :  { %3722 = vmatpush3.bf16.msra.mxu1 %v4574_v39 }
 0x217   :  { %3954 = vmatpush3.bf16.msra.mxu0 %v4534_v25  ;;  %3772 = vmatprep.subr.bf16.mxu1 %v4438_v53 }
 0x218   :  { %3956 = vmatprep.subr.bf16.mxu0 %v4548_v30 }
 0x219   :  { %3205 = vmatmul.mubr.f32.vlgmr.msra.gmra.mrb[2].mxu1 %v4765_v11 }
 0x21a   :  { %3774 = vmatpush3.bf16.msra.mxu1 %v4438_v53  ;;  %3305 = vmatprep.mubr.f32.mxu1 %v2005_v3  ;;  %v2015_v53 = vand.u32 4294901760, %v4819_v45 }
 0x21b   :  { %3958 = vmatpush3.bf16.msra.mxu0 %v4548_v30  ;;  %3776 = vmatprep.subr.bf16.mxu1 %v4452_v59 }
 0x21c   :  { %3960 = vmatprep.subr.bf16.mxu0 %v4574_v39 }
 0x21e   :  { %3778 = vmatpush3.bf16.msra.mxu1 %v4452_v59  ;;  %v2642_v59 = vld [vmem:[%s5015_s6] ss:$0 sm:$0xff] }
 0x21f   :  { %3962 = vmatpush3.bf16.msra.mxu0 %v4574_v39  ;;  %3780 = vmatprep.subr.bf16.mxu1 %v4498_v12 }
 0x222   :  { %3481 = vmatmul.mubr.f32.vlgmr.msra.gmra.mrb[4].mxu0 %v4800_v35  ;;  %3782 = vmatpush3.bf16.msra.mxu1 %v4498_v12 }
 0x223   :  { %3784 = vmatprep.subr.bf16.mxu1 %v4504_v15 }
 0x226   :  { %3786 = vmatpush3.bf16.msra.mxu1 %v4504_v15 }
 0x227   :  { %3788 = vmatprep.subr.bf16.mxu1 %v4520_v20 }
 0x22a   :  { %3790 = vmatpush3.bf16.msra.mxu1 %v4520_v20 }
 0x22b   :  { %3792 = vmatprep.subr.bf16.mxu1 %v4534_v25 }
 0x22e   :  { %3794 = vmatpush3.bf16.msra.mxu1 %v4534_v25 }
 0x22f   :  { %3796 = vmatprep.subr.bf16.mxu1 %v4548_v30 }
 0x232   :  { %3798 = vmatpush3.bf16.msra.mxu1 %v4548_v30 }
 0x233   :  { %3800 = vmatprep.subr.bf16.mxu1 %v4574_v39 }
 0x236   :  { %3802 = vmatpush3.bf16.msra.mxu1 %v4574_v39 }
 0x239   :  { %3306 = vmatmul.mubr.f32.vlgmr.msra.gmra.mrb[4].mxu1 %v2015_v53 }
 0x2ec   :  { %v3206_v12 = vpop.f32.mrb[2].mxu1 }
 0x2ed   :  { %v3967_v15 = vadd.f32 %v3206_v12, %v2642_v59  ;;  %v1364_v20 = vpop.f32.mrb[3].mxu1 }
 0x2ee   :  { %v3968_v25 = vadd.f32 %v2642_v59, %v1364_v20 }
 0x2ef   :  { %1375 = vst [vmem:[#allocation14 + $0x8] sm:$0xff] %v3967_v15 }
 0x2f0   :  { %1374 = vst [vmem:[#allocation14] sm:$0xff] %v3968_v25 }
 0x2f1   :  { %4164 = shalt.err (!%p4161_p10)
}
 0x2f2   :  { %s4165_s6 = scalar_lea.hbm %s5017_s8, 256 }
 0x2f3   :  { %p4166_p11 = scmp.ne.s32.totalorder %s5017_s8, %s4165_s6  ;;  %p4169_p12 = scmp.lt.u32.totalorder %s4165_s6, %s5017_s8 }
 0x2f5   :  { %p4171_p13 = pnand %p4169_p12, %p4166_p11 }
 0x2f7   :  { %4174 = shalt.err (!%p4171_p13)
}
 0x2f8   :  { %2617 = dma.vmem_to_hbm [thread:$0]  %s2612_s20, 256, %s5017_s8, [#allocation5], %s4211_s21, %s4211_s21, %s4212_s22   ;;  %v3482_v30 = vpop.f32.mrb[4].mxu0 }
 0x2f9   :  { %v2594_v39 = vpop.f32.mrb[5].mxu0  ;;  %s4218_s28 = smov [#allocation15]  }
 0x2fa   :  { %s2623_s29 = sshll.u32 %s4218_s28, 4  ;;  %s2624_s29 = int_to_ptr.vmem [resolvable:$true] %s2623_s29 }
 0x2fb   :  { %s4175_s30 = scalar_lea.vmem %s2624_s29, 256  ;;  %p4180_p1 = scmp.lt.s32.totalorder %s2624_s29, %s2624_s29 }
 0x2fc   :  { %p4176_p0 = scmp.ne.s32.totalorder %s2624_s29, %s4175_s30  ;;  %p4181_p2 = scmp.lt.s32.totalorder %s4175_s30, %s4175_s30 }
 0x2fe   :  { %p4182_p3 = por %p4181_p2, %p4180_p1 }
 0x300   :  { %p4183_p4 = pnand %p4182_p3, %p4176_p0 }
 0x30c   :  { %v3307_v6 = vpop.f32.mrb[4].mxu1 }
 0x30d   :  { %v2018_v7 = vadd.f32 %v3307_v6, %v2642_v59  ;;  %v2007_v11 = vpop.f32.mrb[5].mxu1 }
 0x30e   :  { %v2008_v17 = vadd.f32 %v2642_v59, %v2007_v11 }
 0x30f   :  { %v3972_v18 = vadd.f32 %v3482_v30, %v2018_v7 }
 0x310   :  { %v3974_v23 = vadd.f32 %v2594_v39, %v2008_v17 }
 0x311   :  { %2605 = vst [vmem:[#allocation15 + $0x8] sm:$0xf] %v3972_v18 }
 0x312   :  { %2604 = vst [vmem:[#allocation15] sm:$0xff] %v3974_v23 }
 0x313   :  { %4186 = shalt.err (!%p4183_p4)
}
 0x314   :  { %s4187_s13 = scalar_lea.hbm %s5018_s9, 256 }
 0x315   :  { %p4188_p5 = scmp.ne.s32.totalorder %s5018_s9, %s4187_s13  ;;  %p4191_p6 = scmp.lt.u32.totalorder %s4187_s13, %s5018_s9 }
 0x317   :  { %p4193_p7 = pnand %p4191_p6, %p4188_p5 }
 0x319   :  { %4196 = shalt.err (!%p4193_p7)
}
 0x31a   :  { %2629 = dma.vmem_to_hbm [thread:$0]  %s2624_s29, 256, %s5018_s9, [#allocation16], %s4211_s21, %s4211_s21, %s4212_s22  }
 0x31b   :  { %4205 = dma.done.wait [#allocation5], 256  }
 0x31c   :  { %4206 = vsyncadd [#allocation5], 4294967040 }
 0x31d   :  { %4207 = dma.done.wait [#allocation16], 256  }
 0x31e   :  { %4208 = vsyncadd [#allocation16], 4294967040 }
 0x31f   :  { %2636 = vsyncpa [#allocation4], 1 }
 0x320   :  { %2637 = vsyncpa [#allocation7], 1 }
 0x321   :  { %2638 = vsyncpa [#allocation10], 1 }
 0x322   :  { %2639 = vsyncpa [#allocation13], 1 }
 0x323   :  { %2640 = vsyncpa [#allocation5], 1 }
 0x324   :  { %2641 = vsyncpa [#allocation16], 1 }

</bundles_post_ra>
